<compile_context>
chip_gen: v7x
topology: tpu7x:2x2x1
jax: 0.10.0
libtpu: 0.0.40
codegen_flags: <defaults>
</compile_context>

<pallas_src>
import functools

import jax
import jax.numpy as jnp
from jax import lax
from jax.experimental import pallas as pl
from jax.experimental.pallas import tpu as pltpu


def _round_up(x, m):
    return ((x + m - 1) // m) * m


def _dotT(a, b):
    """a @ b.T  contracting last axes (both 2-D)."""
    return lax.dot_general(a, b, (((1,), (1,)), ((), ())),
                           preferred_element_type=jnp.float32)


def _tdot(a, b):
    """a.T @ b  contracting first axes (both 2-D)."""
    return lax.dot_general(a, b, (((0,), (0,)), ((), ())),
                           preferred_element_type=jnp.float32)


def _reference_layer_kernel(inv_g_ref, atoms_ref, xi_ref, xj_ref, ai_ref,
                            aj_ref, m_ref, out_ref, xx_acc, xya_acc,
                            *, use_bf16_matmul):
    # inv_g_ref: (1,) SMEM (1/gamma)      atoms_ref: (CS, D)
    # xi_ref/xj_ref: (TN, D) node tiles   ai_ref/aj_ref: (TN, B) averaging tiles
    # m_ref: (CS, C)                      out_ref: (B, C)
    # xx_acc: VMEM (B, 1)                 xya_acc: VMEM (CS, B)
    i = pl.program_id(0)
    j = pl.program_id(1)
    last_i = pl.num_programs(0) - 1
    last_j = pl.num_programs(1) - 1

    mm_dt = jnp.bfloat16 if use_bf16_matmul else jnp.float32

    inv_g = inv_g_ref[0]
    two_inv_g = 2.0 * inv_g

    @pl.when((i == 0) & (j == 0))
    def _init():
        xx_acc[...] = jnp.zeros_like(xx_acc)
        xya_acc[...] = jnp.zeros_like(xya_acc)

    xi = xi_ref[...]
    xj = xj_ref[...]
    ai = ai_ref[...]
    aj = aj_ref[...]

    # Squared norms, computed once and pre-scaled by 1/gamma.
    ones_d = jnp.ones((1, xj.shape[1]), jnp.float32)
    xj_sq_row = _dotT(ones_d, xj * xj) * inv_g                       # (1, TN)
    xi_sq_col = jnp.sum(xi * xi, axis=-1, keepdims=True) * inv_g     # (TN, 1)

    # k_xx tile:  exp(-(|xi|^2 + |xj|^2 - 2 xi.xj)/g)
    #           = exp((2/g) xi.xj - |xi|^2/g - |xj|^2/g)   (no divide, no 2*)
    xi_s = (xi * two_inv_g).astype(mm_dt)
    xj_c = xj.astype(mm_dt)
    k_xx = jnp.exp(_dotT(xi_s, xj_c) - xi_sq_col - xj_sq_row)        # (TN, TN)

    # xx[b] += sum_i A_i[i, b] * (k_xx @ A_j)[i, b]   (no BxB, no eye mask)
    ka = jnp.dot(k_xx, aj, preferred_element_type=jnp.float32)       # (TN, B)
    ones_n = jnp.ones((xi.shape[0], 1), jnp.float32)
    xx_acc[...] += _tdot(ai * ka, ones_n)                            # (B, 1)

    # Cross term only needs the j axis -> accumulate once per j tile (i == 0).
    @pl.when(i == 0)
    def _xy():
        a = atoms_ref[...]
        a_sq_col = jnp.sum(a * a, axis=-1, keepdims=True) * inv_g    # (CS, 1)
        a_s = (a * two_inv_g).astype(mm_dt)
        k_xy = jnp.exp(_dotT(a_s, xj_c) - a_sq_col - xj_sq_row)      # (CS, TN)
        xya_acc[...] += jnp.dot(k_xy, aj,
                                preferred_element_type=jnp.float32)  # (CS, B)

    # Finalize: atoms-only yy term, MMD, softmax over channels.
    @pl.when((i == last_i) & (j == last_j))
    def _fin():
        a = atoms_ref[...]
        m = m_ref[...]
        a2 = a * a
        a_sq_col = jnp.sum(a2, axis=-1, keepdims=True) * inv_g       # (CS, 1)
        a_sq_row = _dotT(ones_d, a2) * inv_g                         # (1, CS)
        a_s = (a * two_inv_g).astype(mm_dt)
        k_yy = jnp.exp(_dotT(a_s, a.astype(mm_dt))
                       - a_sq_col - a_sq_row)                        # (CS, CS)
        yy_row = jnp.sum(
            m * jnp.dot(k_yy, m, preferred_element_type=jnp.float32),
            axis=0, keepdims=True)                                   # (1, C)
        xy_bc = _tdot(xya_acc[...], m)                               # (B, C)

        # Clamp: fp cancellation can push the MMD^2 slightly negative -> NaN.
        arg = jnp.maximum(xx_acc[...] + yy_row - 2.0 * xy_bc, 0.0)
        mmd = jnp.sqrt(arg)                                          # (B, C)

        # softmax(-mmd); mmd >= 0 so exp(-mmd) <= 1 (numerically safe).
        e = jnp.exp(-mmd)
        out_ref[...] = (e / jnp.sum(e, axis=1, keepdims=True)).astype(out_ref.dtype)


def reference_layer_forward(atoms, x, batch, gamma, num_graphs, *,
                            tile_n=512, use_bf16_matmul=False):
    """atoms: (C, S, D) f32, x: (N, D) f32, batch: (N,) int32 in [0, num_graphs),
    gamma: scalar, num_graphs: static int (no device->host sync)."""
    C, S, D = atoms.shape
    N = x.shape[0]
    B = int(num_graphs)
    CS = C * S

    atoms_flat = atoms.reshape(CS, D).astype(jnp.float32)

    # Node tiling: pad N to a multiple of the tile. Padded rows are zero in A,
    # so their (finite) kernel values never contribute to xx / xy.
    TN = min(tile_n, _round_up(N, 8))
    Np = _round_up(N, TN)

    x_p = jnp.zeros((Np, D), jnp.float32).at[:N].set(x.astype(jnp.float32))
    batch_p = jnp.full((Np,), -1, dtype=jnp.int32).at[:N].set(
        batch.astype(jnp.int32))

    # Graph-averaging matrix A (Np, B): A[i, b] = 1/|graph b| if batch[i] == b.
    onehot = (batch_p[:, None] == jnp.arange(B, dtype=jnp.int32)[None, :]
              ).astype(jnp.float32)
    counts = jnp.sum(onehot, axis=0, keepdims=True)
    A = onehot / counts

    # Per-channel averaging matrix M (CS, C): M[c*S + s, c] = 1/S.
    M = ((jnp.arange(CS, dtype=jnp.int32) // S)[:, None]
         == jnp.arange(C, dtype=jnp.int32)[None, :]).astype(jnp.float32) / float(S)

    inv_gamma = (1.0 / jnp.asarray(gamma, jnp.float32)).reshape(1)

    grid = (Np // TN, Np // TN)
    kernel = functools.partial(_reference_layer_kernel,
                               use_bf16_matmul=use_bf16_matmul)

    out = pl.pallas_call(
        kernel,
        out_shape=jax.ShapeDtypeStruct((B, C), jnp.float32),
        grid_spec=pltpu.PrefetchScalarGridSpec(
            num_scalar_prefetch=0,
            grid=grid,
            in_specs=[
                pl.BlockSpec(memory_space=pltpu.MemorySpace.SMEM),  # 1/gamma
                pl.BlockSpec((CS, D), lambda i, j: (0, 0)),         # atoms
                pl.BlockSpec((TN, D), lambda i, j: (i, 0)),         # x rows  (i)
                pl.BlockSpec((TN, D), lambda i, j: (j, 0)),         # x cols  (j)
                pl.BlockSpec((TN, B), lambda i, j: (i, 0)),         # A rows  (i)
                pl.BlockSpec((TN, B), lambda i, j: (j, 0)),         # A cols  (j)
                pl.BlockSpec((CS, C), lambda i, j: (0, 0)),         # M
            ],
            out_specs=pl.BlockSpec((B, C), lambda i, j: (0, 0)),
            scratch_shapes=[
                pltpu.VMEM((B, 1), jnp.float32),    # xx accumulator
                pltpu.VMEM((CS, B), jnp.float32),   # (k_xy @ A) accumulator
            ],
        ),
        # Both axes feed the shared accumulators/output -> must be "arbitrary".
        # TODO(synk): for v7x megacore, split xx into per-core partials so the
        # i-tile axis can be marked "parallel".
        compiler_params=pltpu.CompilerParams(
            dimension_semantics=("arbitrary", "arbitrary"),
            vmem_limit_bytes=64 * 1024 * 1024,
        ),
    )(inv_gamma, atoms_flat, x_p, x_p, A, A, M)
    return out


def reference_layer_forward_jax_ref(atoms, x, batch, gamma):
    """Pure-JAX mirror of the PyTorch cal_mmd + forward (for validation)."""
    d_xy = ((atoms[:, :, None, :] - x[None, None, :, :]) ** 2).sum(-1)
    k_xy = jnp.exp(-d_xy / gamma)
    d_yy = ((atoms[:, :, None, :] - atoms[:, None, :, :]) ** 2).sum(-1)
    k_yy = jnp.exp(-d_yy / gamma)
    d_xx = ((x[:, None, :] - x[None, :, :]) ** 2).sum(-1)
    k_xx = jnp.exp(-d_xx / gamma)
    B = int(jnp.max(batch)) + 1
    onehot = (batch[:, None] == jnp.arange(B)[None, :]).astype(jnp.float32)
    A = onehot / jnp.sum(onehot, axis=0, keepdims=True)
    xx = jnp.diag(A.T @ k_xx @ A)
    xy = jnp.mean(k_xy @ A, axis=1)
    yy = k_yy.mean(axis=1).mean(axis=1)
    mmd = jnp.sqrt((yy[:, None] + xx[None, :] - 2.0 * xy).T)
    e = jnp.exp(-mmd)
    return e / jnp.sum(e, axis=1, keepdims=True)


if __name__ == "__main__":
    # small shapes: C=4 output channels, S=8 supports, D=32 features,
    # N=16 nodes split across B=2 graphs.
    C, S, D, N = 4, 8, 32, 16
    gamma = 10.0
    B = 2

    key = jax.random.PRNGKey(0)
    k_atoms, k_x = jax.random.split(key)
    atoms = jax.random.normal(k_atoms, (C, S, D), dtype=jnp.float32)  # normal_(0,1)
    x = jax.random.normal(k_x, (N, D), dtype=jnp.float32)
    batch = jnp.array([0] * 7 + [1] * 9, dtype=jnp.int32)             # 2 graphs

    out = reference_layer_forward(atoms, x, batch, gamma, num_graphs=B)
    out = jax.block_until_ready(out)

    ref = reference_layer_forward_jax_ref(atoms, x, batch, gamma)
    assert out.shape == ref.shape == (B, C)
    assert jnp.allclose(out, ref, rtol=1e-3, atol=1e-3), (out, ref)

    print("KERNEL_OK")
</pallas_src>

<mosaic_0001>
module attributes {stable_mosaic.version = 11 : i64} {
  func.func @_reference_layer_kernel(%arg0: i32, %arg1: i32, %arg2: memref<1xf32, #tpu.memory_space<smem>>, %arg3: memref<32x32xf32, #tpu.memory_space<vmem>>, %arg4: memref<16x32xf32, #tpu.memory_space<vmem>>, %arg5: memref<16x32xf32, #tpu.memory_space<vmem>>, %arg6: memref<16x2xf32, #tpu.memory_space<vmem>>, %arg7: memref<16x2xf32, #tpu.memory_space<vmem>>, %arg8: memref<32x4xf32, #tpu.memory_space<vmem>>, %arg9: memref<2x4xf32, #tpu.memory_space<vmem>>, %arg10: memref<2x1xf32, #tpu.memory_space<vmem>>, %arg11: memref<32x2xf32, #tpu.memory_space<vmem>>) attributes {dimension_semantics = [#tpu.dimension_semantics<arbitrary>, #tpu.dimension_semantics<arbitrary>], iteration_bounds = array<i64: 1, 1>, scalar_prefetch = 0 : i64, scratch_operands = 2 : i64, tpu.core_type = #tpu.core_type<tc>, window_params = [{transform_indices = @transform_0, window_bounds = array<i64: 1>}, {pipeline_mode = #tpu.pipeline_mode<synchronous>, transform_indices = @transform_1, window_bounds = array<i64: 32, 32>}, {transform_indices = @transform_2, window_bounds = array<i64: 16, 32>}, {transform_indices = @transform_3, window_bounds = array<i64: 16, 32>}, {transform_indices = @transform_4, window_bounds = array<i64: 16, 2>}, {transform_indices = @transform_5, window_bounds = array<i64: 16, 2>}, {pipeline_mode = #tpu.pipeline_mode<synchronous>, transform_indices = @transform_6, window_bounds = array<i64: 32, 4>}, {pipeline_mode = #tpu.pipeline_mode<synchronous>, transform_indices = @transform_7, window_bounds = array<i64: 2, 4>}]} {
    %c0 = arith.constant 0 : index
    %0 = memref.load %arg2[%c0] : memref<1xf32, #tpu.memory_space<smem>>
    %cst = arith.constant 2.000000e+00 : f32
    %1 = arith.mulf %cst, %0 : f32
    %c0_i32 = arith.constant 0 : i32
    %2 = arith.cmpi eq, %arg0, %c0_i32 : i32
    %c0_i32_0 = arith.constant 0 : i32
    %3 = arith.cmpi eq, %arg1, %c0_i32_0 : i32
    %4 = arith.andi %2, %3 : i1
    %5 = arith.extui %4 : i1 to i32
    %c0_i32_1 = arith.constant 0 : i32
    %6 = arith.cmpi ne, %5, %c0_i32_1 : i32
    scf.if %6 {
      %cst_26 = arith.constant 0.000000e+00 : f32
      %44 = vector.broadcast %cst_26 : f32 to vector<2x1xf32>
      %c0_27 = arith.constant 0 : index
      %c0_28 = arith.constant 0 : index
      %45 = vector.load %arg10[%c0_27, %c0_28] : memref<2x1xf32, #tpu.memory_space<vmem>>, vector<2x1xf32>
      tpu.vector_store %arg10[%c0_27, %c0_28], %44 {strides = array<i32>} : memref<2x1xf32, #tpu.memory_space<vmem>>, vector<2x1xf32>,
      %cst_29 = arith.constant 0.000000e+00 : f32
      %46 = vector.broadcast %cst_29 : f32 to vector<32x2xf32>
      %c0_30 = arith.constant 0 : index
      %c0_31 = arith.constant 0 : index
      %47 = vector.load %arg11[%c0_30, %c0_31] : memref<32x2xf32, #tpu.memory_space<vmem>>, vector<32x2xf32>
      tpu.vector_store %arg11[%c0_30, %c0_31], %46 {strides = array<i32>} : memref<32x2xf32, #tpu.memory_space<vmem>>, vector<32x2xf32>,
    } else {
    }
    %c0_2 = arith.constant 0 : index
    %c0_3 = arith.constant 0 : index
    %7 = vector.load %arg4[%c0_2, %c0_3] : memref<16x32xf32, #tpu.memory_space<vmem>>, vector<16x32xf32>
    %c0_4 = arith.constant 0 : index
    %c0_5 = arith.constant 0 : index
    %8 = vector.load %arg5[%c0_4, %c0_5] : memref<16x32xf32, #tpu.memory_space<vmem>>, vector<16x32xf32>
    %c0_6 = arith.constant 0 : index
    %c0_7 = arith.constant 0 : index
    %9 = vector.load %arg6[%c0_6, %c0_7] : memref<16x2xf32, #tpu.memory_space<vmem>>, vector<16x2xf32>
    %c0_8 = arith.constant 0 : index
    %c0_9 = arith.constant 0 : index
    %10 = vector.load %arg7[%c0_8, %c0_9] : memref<16x2xf32, #tpu.memory_space<vmem>>, vector<16x2xf32>
    %cst_10 = arith.constant 1.000000e+00 : f32
    %11 = vector.broadcast %cst_10 : f32 to vector<1x32xf32>
    %12 = arith.mulf %8, %8 : vector<16x32xf32>
    %cst_11 = arith.constant dense<0.000000e+00> : vector<1x16xf32>
    %13 = tpu.matmul %11, %12, %cst_11 {dimension_numbers = #tpu.dot_dimension_numbers<[1], [1], [0], [0], [0, 0, 1, 0], [], []>} : vector<1x32xf32>, vector<16x32xf32>, vector<1x16xf32> -> vector<1x16xf32>
    %14 = vector.broadcast %0 : f32 to vector<1x16xf32>
    %15 = arith.mulf %13, %14 : vector<1x16xf32>
    %16 = arith.mulf %7, %7 : vector<16x32xf32>
    %cst_12 = arith.constant dense<0.000000e+00> : vector<16xf32>
    %17 = vector.multi_reduction <add>, %16, %cst_12 [1] : vector<16x32xf32> to vector<16xf32>
    %18 = vector.shape_cast %17 : vector<16xf32> to vector<16x1xf32>
    %19 = vector.broadcast %0 : f32 to vector<16x1xf32>
    %20 = arith.mulf %18, %19 : vector<16x1xf32>
    %21 = vector.broadcast %1 : f32 to vector<16x32xf32>
    %22 = arith.mulf %7, %21 : vector<16x32xf32>
    %cst_13 = arith.constant dense<0.000000e+00> : vector<16x16xf32>
    %23 = tpu.matmul %22, %8, %cst_13 {dimension_numbers = #tpu.dot_dimension_numbers<[1], [1], [0], [0], [0, 0, 1, 0], [], []>} : vector<16x32xf32>, vector<16x32xf32>, vector<16x16xf32> -> vector<16x16xf32>
    %24 = vector.broadcast %20 : vector<16x1xf32> to vector<16x16xf32>
    %25 = arith.subf %23, %24 : vector<16x16xf32>
    %26 = vector.broadcast %15 : vector<1x16xf32> to vector<16x16xf32>
    %27 = arith.subf %25, %26 : vector<16x16xf32>
    %28 = math.exp %27 : vector<16x16xf32>
    %cst_14 = arith.constant dense<0.000000e+00> : vector<16x2xf32>
    %29 = tpu.matmul %28, %10, %cst_14 {dimension_numbers = #tpu.dot_dimension_numbers<[1], [0], [0], [1], [0, 0, 1, 1], [], []>} : vector<16x16xf32>, vector<16x2xf32>, vector<16x2xf32> -> vector<16x2xf32>
    %cst_15 = arith.constant 1.000000e+00 : f32
    %30 = vector.broadcast %cst_15 : f32 to vector<16x1xf32>
    %c0_16 = arith.constant 0 : index
    %c0_17 = arith.constant 0 : index
    %31 = vector.load %arg10[%c0_16, %c0_17] : memref<2x1xf32, #tpu.memory_space<vmem>>, vector<2x1xf32>
    %32 = arith.mulf %9, %29 : vector<16x2xf32>
    %cst_18 = arith.constant dense<0.000000e+00> : vector<2x1xf32>
    %33 = tpu.matmul %32, %30, %cst_18 {dimension_numbers = #tpu.dot_dimension_numbers<[0], [0], [1], [1], [0, 1, 1, 1], [], []>} : vector<16x2xf32>, vector<16x1xf32>, vector<2x1xf32> -> vector<2x1xf32>
    %34 = arith.addf %31, %33 : vector<2x1xf32>
    %c0_19 = arith.constant 0 : index
    %c0_20 = arith.constant 0 : index
    %35 = vector.load %arg10[%c0_19, %c0_20] : memref<2x1xf32, #tpu.memory_space<vmem>>, vector<2x1xf32>
    tpu.vector_store %arg10[%c0_19, %c0_20], %34 {strides = array<i32>} : memref<2x1xf32, #tpu.memory_space<vmem>>, vector<2x1xf32>,
    %c0_i32_21 = arith.constant 0 : i32
    %36 = arith.cmpi eq, %arg0, %c0_i32_21 : i32
    %37 = arith.extui %36 : i1 to i32
    %c0_i32_22 = arith.constant 0 : i32
    %38 = arith.cmpi ne, %37, %c0_i32_22 : i32
    scf.if %38 {
      %c0_26 = arith.constant 0 : index
      %c0_27 = arith.constant 0 : index
      %44 = vector.load %arg3[%c0_26, %c0_27] : memref<32x32xf32, #tpu.memory_space<vmem>>, vector<32x32xf32>
      %45 = arith.mulf %44, %44 : vector<32x32xf32>
      %cst_28 = arith.constant dense<0.000000e+00> : vector<32xf32>
      %46 = vector.multi_reduction <add>, %45, %cst_28 [1] : vector<32x32xf32> to vector<32xf32>
      %47 = vector.shape_cast %46 : vector<32xf32> to vector<32x1xf32>
      %48 = vector.broadcast %0 : f32 to vector<32x1xf32>
      %49 = arith.mulf %47, %48 : vector<32x1xf32>
      %50 = vector.broadcast %1 : f32 to vector<32x32xf32>
      %51 = arith.mulf %44, %50 : vector<32x32xf32>
      %cst_29 = arith.constant dense<0.000000e+00> : vector<32x16xf32>
      %52 = tpu.matmul %51, %8, %cst_29 {dimension_numbers = #tpu.dot_dimension_numbers<[1], [1], [0], [0], [0, 0, 1, 0], [], []>} : vector<32x32xf32>, vector<16x32xf32>, vector<32x16xf32> -> vector<32x16xf32>
      %53 = vector.broadcast %49 : vector<32x1xf32> to vector<32x16xf32>
      %54 = arith.subf %52, %53 : vector<32x16xf32>
      %55 = vector.broadcast %15 : vector<1x16xf32> to vector<32x16xf32>
      %56 = arith.subf %54, %55 : vector<32x16xf32>
      %57 = math.exp %56 : vector<32x16xf32>
      %c0_30 = arith.constant 0 : index
      %c0_31 = arith.constant 0 : index
      %58 = vector.load %arg11[%c0_30, %c0_31] : memref<32x2xf32, #tpu.memory_space<vmem>>, vector<32x2xf32>
      %cst_32 = arith.constant dense<0.000000e+00> : vector<32x2xf32>
      %59 = tpu.matmul %57, %10, %cst_32 {dimension_numbers = #tpu.dot_dimension_numbers<[1], [0], [0], [1], [0, 0, 1, 1], [], []>} : vector<32x16xf32>, vector<16x2xf32>, vector<32x2xf32> -> vector<32x2xf32>
      %60 = arith.addf %58, %59 : vector<32x2xf32>
      %c0_33 = arith.constant 0 : index
      %c0_34 = arith.constant 0 : index
      %61 = vector.load %arg11[%c0_33, %c0_34] : memref<32x2xf32, #tpu.memory_space<vmem>>, vector<32x2xf32>
      tpu.vector_store %arg11[%c0_33, %c0_34], %60 {strides = array<i32>} : memref<32x2xf32, #tpu.memory_space<vmem>>, vector<32x2xf32>,
    } else {
    }
    %c0_i32_23 = arith.constant 0 : i32
    %39 = arith.cmpi eq, %arg0, %c0_i32_23 : i32
    %c0_i32_24 = arith.constant 0 : i32
    %40 = arith.cmpi eq, %arg1, %c0_i32_24 : i32
    %41 = arith.andi %39, %40 : i1
    %42 = arith.extui %41 : i1 to i32
    %c0_i32_25 = arith.constant 0 : i32
    %43 = arith.cmpi ne, %42, %c0_i32_25 : i32
    scf.if %43 {
      %c0_26 = arith.constant 0 : index
      %c0_27 = arith.constant 0 : index
      %44 = vector.load %arg3[%c0_26, %c0_27] : memref<32x32xf32, #tpu.memory_space<vmem>>, vector<32x32xf32>
      %c0_28 = arith.constant 0 : index
      %c0_29 = arith.constant 0 : index
      %45 = vector.load %arg8[%c0_28, %c0_29] : memref<32x4xf32, #tpu.memory_space<vmem>>, vector<32x4xf32>
      %46 = arith.mulf %44, %44 : vector<32x32xf32>
      %cst_30 = arith.constant dense<0.000000e+00> : vector<32xf32>
      %47 = vector.multi_reduction <add>, %46, %cst_30 [1] : vector<32x32xf32> to vector<32xf32>
      %48 = vector.shape_cast %47 : vector<32xf32> to vector<32x1xf32>
      %49 = vector.broadcast %0 : f32 to vector<32x1xf32>
      %50 = arith.mulf %48, %49 : vector<32x1xf32>
      %cst_31 = arith.constant dense<0.000000e+00> : vector<1x32xf32>
      %51 = tpu.matmul %11, %46, %cst_31 {dimension_numbers = #tpu.dot_dimension_numbers<[1], [1], [0], [0], [0, 0, 1, 0], [], []>} : vector<1x32xf32>, vector<32x32xf32>, vector<1x32xf32> -> vector<1x32xf32>
      %52 = vector.broadcast %0 : f32 to vector<1x32xf32>
      %53 = arith.mulf %51, %52 : vector<1x32xf32>
      %54 = vector.broadcast %1 : f32 to vector<32x32xf32>
      %55 = arith.mulf %44, %54 : vector<32x32xf32>
      %cst_32 = arith.constant dense<0.000000e+00> : vector<32x32xf32>
      %56 = tpu.matmul %55, %44, %cst_32 {dimension_numbers = #tpu.dot_dimension_numbers<[1], [1], [0], [0], [0, 0, 1, 0], [], []>} : vector<32x32xf32>, vector<32x32xf32>, vector<32x32xf32> -> vector<32x32xf32>
      %57 = vector.broadcast %50 : vector<32x1xf32> to vector<32x32xf32>
      %58 = arith.subf %56, %57 : vector<32x32xf32>
      %59 = vector.broadcast %53 : vector<1x32xf32> to vector<32x32xf32>
      %60 = arith.subf %58, %59 : vector<32x32xf32>
      %61 = math.exp %60 : vector<32x32xf32>
      %cst_33 = arith.constant dense<0.000000e+00> : vector<32x4xf32>
      %62 = tpu.matmul %61, %45, %cst_33 {dimension_numbers = #tpu.dot_dimension_numbers<[1], [0], [0], [1], [0, 0, 1, 1], [], []>} : vector<32x32xf32>, vector<32x4xf32>, vector<32x4xf32> -> vector<32x4xf32>
      %63 = arith.mulf %45, %62 : vector<32x4xf32>
      %cst_34 = arith.constant dense<0.000000e+00> : vector<4xf32>
      %64 = vector.multi_reduction <add>, %63, %cst_34 [0] : vector<32x4xf32> to vector<4xf32>
      %65 = vector.shape_cast %64 : vector<4xf32> to vector<1x4xf32>
      %c0_35 = arith.constant 0 : index
      %c0_36 = arith.constant 0 : index
      %66 = vector.load %arg11[%c0_35, %c0_36] : memref<32x2xf32, #tpu.memory_space<vmem>>, vector<32x2xf32>
      %cst_37 = arith.constant dense<0.000000e+00> : vector<2x4xf32>
      %67 = tpu.matmul %66, %45, %cst_37 {dimension_numbers = #tpu.dot_dimension_numbers<[0], [0], [1], [1], [0, 1, 1, 1], [], []>} : vector<32x2xf32>, vector<32x4xf32>, vector<2x4xf32> -> vector<2x4xf32>
      %c0_38 = arith.constant 0 : index
      %c0_39 = arith.constant 0 : index
      %68 = vector.load %arg10[%c0_38, %c0_39] : memref<2x1xf32, #tpu.memory_space<vmem>>, vector<2x1xf32>
      %69 = vector.broadcast %68 : vector<2x1xf32> to vector<2x4xf32>
      %70 = vector.broadcast %65 : vector<1x4xf32> to vector<2x4xf32>
      %71 = arith.addf %69, %70 : vector<2x4xf32>
      %cst_40 = arith.constant 2.000000e+00 : f32
      %72 = vector.broadcast %cst_40 : f32 to vector<2x4xf32>
      %73 = arith.mulf %72, %67 : vector<2x4xf32>
      %74 = arith.subf %71, %73 : vector<2x4xf32>
      %cst_41 = arith.constant 0.000000e+00 : f32
      %75 = vector.broadcast %cst_41 : f32 to vector<2x4xf32>
      %76 = arith.maximumf %74, %75 : vector<2x4xf32>
      %77 = math.sqrt %76 : vector<2x4xf32>
      %cst_42 = arith.constant 0.000000e+00 : f32
      %78 = vector.broadcast %cst_42 : f32 to vector<2x4xf32>
      %79 = arith.subf %78, %77 : vector<2x4xf32>
      %80 = math.exp %79 : vector<2x4xf32>
      %cst_43 = arith.constant dense<0.000000e+00> : vector<2xf32>
      %81 = vector.multi_reduction <add>, %80, %cst_43 [1] : vector<2x4xf32> to vector<2xf32>
      %82 = vector.shape_cast %81 : vector<2xf32> to vector<2x1xf32>
      %83 = vector.broadcast %82 : vector<2x1xf32> to vector<2x4xf32>
      %84 = arith.divf %80, %83 : vector<2x4xf32>
      %c0_44 = arith.constant 0 : index
      %c0_45 = arith.constant 0 : index
      %85 = vector.load %arg9[%c0_44, %c0_45] : memref<2x4xf32, #tpu.memory_space<vmem>>, vector<2x4xf32>
      tpu.vector_store %arg9[%c0_44, %c0_45], %84 {strides = array<i32>} : memref<2x4xf32, #tpu.memory_space<vmem>>, vector<2x4xf32>,
    } else {
    }
    return
  }
  func.func @transform_0(%arg0: i32, %arg1: i32) -> i32 {
    %c0_i32 = arith.constant 0 : i32
    %c0_i32_0 = arith.constant 0 : i32
    return %c0_i32 : i32
  }
  func.func @transform_1(%arg0: i32, %arg1: i32) -> (i32, i32) {
    %c0_i32 = arith.constant 0 : i32
    %c0_i32_0 = arith.constant 0 : i32
    %c0_i32_1 = arith.constant 0 : i32
    return %c0_i32, %c0_i32_0 : i32, i32
  }
  func.func @transform_2(%arg0: i32, %arg1: i32) -> (i32, i32) {
    %c0_i32 = arith.constant 0 : i32
    %c0_i32_0 = arith.constant 0 : i32
    return %arg0, %c0_i32 : i32, i32
  }
  func.func @transform_3(%arg0: i32, %arg1: i32) -> (i32, i32) {
    %c0_i32 = arith.constant 0 : i32
    %c0_i32_0 = arith.constant 0 : i32
    return %arg1, %c0_i32 : i32, i32
  }
  func.func @transform_4(%arg0: i32, %arg1: i32) -> (i32, i32) {
    %c0_i32 = arith.constant 0 : i32
    %c0_i32_0 = arith.constant 0 : i32
    return %arg0, %c0_i32 : i32, i32
  }
  func.func @transform_5(%arg0: i32, %arg1: i32) -> (i32, i32) {
    %c0_i32 = arith.constant 0 : i32
    %c0_i32_0 = arith.constant 0 : i32
    return %arg1, %c0_i32 : i32, i32
  }
  func.func @transform_6(%arg0: i32, %arg1: i32) -> (i32, i32) {
    %c0_i32 = arith.constant 0 : i32
    %c0_i32_0 = arith.constant 0 : i32
    %c0_i32_1 = arith.constant 0 : i32
    return %c0_i32, %c0_i32_0 : i32, i32
  }
  func.func @transform_7(%arg0: i32, %arg1: i32) -> (i32, i32) {
    %c0_i32 = arith.constant 0 : i32
    %c0_i32_0 = arith.constant 0 : i32
    %c0_i32_1 = arith.constant 0 : i32
    return %c0_i32, %c0_i32_0 : i32, i32
  }
}

</mosaic_0001>

<bundles_post_ra>
// kernel: tpu_custom_call.1
= control target key start
LH: loop header
LB: loop body
LE: loop exit
PB: predicated region body
PF: predicated region fallthrough
CT: control target
= control target key end

     0   :  { %13 = vsyncpa [#allocation6], 0  ;;  %s2135_s0 = inlined_call_operand.<no memory space> [shape: f32[1], index: 0, kind: input, shape index: {}]   ;;  %s2136_s1 = inlined_call_operand.hbm [shape: f32[32,32], index: 1, kind: input, shape index: {}]   ;;  %s2137_s2 = inlined_call_operand.hbm [shape: f32[16,32], index: 2, kind: input, shape index: {}]   ;;  %s2138_s3 = inlined_call_operand.hbm [shape: f32[16,32], index: 3, kind: input, shape index: {}]   ;;  %s2139_s4 = inlined_call_operand.hbm [shape: f32[16,2], index: 4, kind: input, shape index: {}]   ;;  %s2140_s5 = inlined_call_operand.hbm [shape: f32[16,2], index: 5, kind: input, shape index: {}]   ;;  %s2141_s6 = inlined_call_operand.hbm [shape: f32[32,4], index: 6, kind: input, shape index: {}]   ;;  %s2142_s7 = inlined_call_operand.hbm [shape: f32[2,4], index: 7, kind: output, shape index: {}]  }
   0x1   :  { %14 = vsyncpa [#allocation9], 0 }
   0x2   :  { %15 = vsyncpa [#allocation12], 0 }
   0x3   :  { %16 = vsyncpa [#allocation15], 0 }
   0x4   :  { %17 = vsyncpa [#allocation7], 0  ;;  %s1745_s24 = smov [#allocation8]   ;;  %s1746_s26 = smov [#allocation11]  }
   0x5   :  { %s37_s25 = sshll.u32 %s1745_s24, 4  ;;  %s61_s27 = sshll.u32 %s1746_s26, 4  ;;  %s38_s25 = int_to_ptr.vmem [resolvable:$true] %s37_s25  ;;  %s1800_s27 = int_to_ptr.vmem [resolvable:$true] %s61_s27 }
   0x6   :  { %s1581_s30 = scalar_lea.hbm %s2137_s2, 256 }
   0x7   :  { %p1582_p0 = scmp.ne.s32.totalorder %s2137_s2, %s1581_s30  ;;  %p1585_p1 = scmp.lt.u32.totalorder %s1581_s30, %s2137_s2 }
   0x9   :  { %p1587_p2 = pnand %p1585_p1, %p1582_p0 }
   0xb   :  { %1590 = shalt.err (!%p1587_p2)
}
   0xc   :  { %s1591_s12 = scalar_lea.vmem %s38_s25, 256  ;;  %p1596_p4 = scmp.lt.s32.totalorder %s38_s25, %s38_s25 }
   0xd   :  { %p1592_p3 = scmp.ne.s32.totalorder %s38_s25, %s1591_s12  ;;  %p1597_p5 = scmp.lt.s32.totalorder %s1591_s12, %s1591_s12 }
   0xf   :  { %p1598_p6 = por %p1597_p5, %p1596_p4 }
  0x11   :  { %p1599_p7 = pnand %p1598_p6, %p1592_p3 }
  0x13   :  { %1602 = shalt.err (!%p1599_p7)
}
  0x14   :  { %s1747_s13 = smov 128   ;;  %s1748_s14 = smov 8  }
  0x15   :  { %43 = dma.hbm_to_vmem [thread:$0]  %s2137_s2, 256, %s38_s25, [#allocation9], %s1747_s13, %s1747_s13, %s1748_s14  }
  0x16   :  { %s1603_s19 = scalar_lea.hbm %s2139_s4, 256 }
  0x17   :  { %p1604_p8 = scmp.ne.s32.totalorder %s2139_s4, %s1603_s19  ;;  %p1607_p9 = scmp.lt.u32.totalorder %s1603_s19, %s2139_s4 }
  0x19   :  { %p1609_p10 = pnand %p1607_p9, %p1604_p8 }
  0x1b   :  { %1612 = shalt.err (!%p1609_p10)
}
  0x1c   :  { %s1613_s24 = scalar_lea.vmem %s1800_s27, 256  ;;  %p1618_p12 = scmp.lt.s32.totalorder %s1800_s27, %s1800_s27 }
  0x1d   :  { %p1614_p11 = scmp.ne.s32.totalorder %s1800_s27, %s1613_s24  ;;  %p1619_p13 = scmp.lt.s32.totalorder %s1613_s24, %s1613_s24 }
  0x1f   :  { %p1620_p0 = por %p1619_p13, %p1618_p12 }
  0x21   :  { %p1621_p1 = pnand %p1620_p0, %p1614_p11 }
  0x23   :  { %1624 = shalt.err (!%p1621_p1)
}
  0x24   :  { %67 = dma.hbm_to_vmem [thread:$0]  %s2139_s4, 256, %s1800_s27, [#allocation12], %s1747_s13, %s1747_s13, %s1748_s14  }
  0x25   :  { %s1749_s26 = smov [#allocation5]   ;;  %s1750_s29 = smov [#allocation10]  }
  0x26   :  { %s25_s28 = sshll.u32 %s1749_s26, 4  ;;  %s49_s30 = sshll.u32 %s1750_s29, 4  ;;  %s26_s28 = int_to_ptr.vmem [resolvable:$true] %s25_s28  ;;  %s1837_s30 = int_to_ptr.vmem [resolvable:$true] %s49_s30 }
  0x27   :  { %s1625_s10 = scalar_lea.hbm %s2136_s1, 512 }
  0x28   :  { %p1626_p2 = scmp.ne.s32.totalorder %s2136_s1, %s1625_s10  ;;  %p1629_p3 = scmp.lt.u32.totalorder %s1625_s10, %s2136_s1 }
  0x2a   :  { %p1631_p4 = pnand %p1629_p3, %p1626_p2 }
  0x2c   :  { %1634 = shalt.err (!%p1631_p4)
}
  0x2d   :  { %s1635_s4 = scalar_lea.vmem %s26_s28, 512  ;;  %p1640_p6 = scmp.lt.s32.totalorder %s26_s28, %s26_s28 }
  0x2e   :  { %p1636_p5 = scmp.ne.s32.totalorder %s26_s28, %s1635_s4  ;;  %p1641_p7 = scmp.lt.s32.totalorder %s1635_s4, %s1635_s4 }
  0x30   :  { %p1642_p8 = por %p1641_p7, %p1640_p6 }
  0x32   :  { %p1643_p9 = pnand %p1642_p8, %p1636_p5 }
  0x34   :  { %1646 = shalt.err (!%p1643_p9)
}
  0x35   :  { %31 = dma.hbm_to_vmem [thread:$0]  %s2136_s1, 512, %s26_s28, [#allocation6], %s1747_s13, %s1747_s13, %s1748_s14  }
  0x36   :  { %s1647_s20 = scalar_lea.hbm %s2138_s3, 256 }
  0x37   :  { %p1648_p10 = scmp.ne.s32.totalorder %s2138_s3, %s1647_s20  ;;  %p1651_p11 = scmp.lt.u32.totalorder %s1647_s20, %s2138_s3 }
  0x39   :  { %p1653_p12 = pnand %p1651_p11, %p1648_p10 }
  0x3b   :  { %1656 = shalt.err (!%p1653_p12)
}
  0x3c   :  { %s1657_s2 = scalar_lea.vmem %s1837_s30, 256  ;;  %p1662_p0 = scmp.lt.s32.totalorder %s1837_s30, %s1837_s30 }
  0x3d   :  { %p1658_p13 = scmp.ne.s32.totalorder %s1837_s30, %s1657_s2  ;;  %p1663_p1 = scmp.lt.s32.totalorder %s1657_s2, %s1657_s2 }
  0x3f   :  { %p1664_p2 = por %p1663_p1, %p1662_p0 }
  0x41   :  { %p1665_p3 = pnand %p1664_p2, %p1658_p13 }
  0x43   :  { %1668 = shalt.err (!%p1665_p3)
}
  0x44   :  { %55 = dma.hbm_to_vmem [thread:$0]  %s2138_s3, 256, %s1837_s30, [#allocation9], %s1747_s13, %s1747_s13, %s1748_s14  }
  0x45   :  { %s1751_s26 = smov [#allocation13]   ;;  %s1752_s29 = smov [#allocation14]  }
  0x46   :  { %s73_s28 = sshll.u32 %s1751_s26, 4  ;;  %s85_s8 = sshll.u32 %s1752_s29, 4  ;;  %s74_s28 = int_to_ptr.vmem [resolvable:$true] %s73_s28  ;;  %s1874_s8 = int_to_ptr.vmem [resolvable:$true] %s85_s8 }
  0x47   :  { %s1669_s11 = scalar_lea.hbm %s2140_s5, 256 }
  0x48   :  { %p1670_p4 = scmp.ne.s32.totalorder %s2140_s5, %s1669_s11  ;;  %p1673_p5 = scmp.lt.u32.totalorder %s1669_s11, %s2140_s5 }
  0x4a   :  { %p1675_p6 = pnand %p1673_p5, %p1670_p4 }
  0x4c   :  { %1678 = shalt.err (!%p1675_p6)
}
  0x4d   :  { %s1679_s3 = scalar_lea.vmem %s74_s28, 256  ;;  %p1684_p8 = scmp.lt.s32.totalorder %s74_s28, %s74_s28 }
  0x4e   :  { %p1680_p7 = scmp.ne.s32.totalorder %s74_s28, %s1679_s3  ;;  %p1685_p9 = scmp.lt.s32.totalorder %s1679_s3, %s1679_s3 }
  0x50   :  { %p1686_p10 = por %p1685_p9, %p1684_p8 }
  0x52   :  { %p1687_p11 = pnand %p1686_p10, %p1680_p7 }
  0x54   :  { %1690 = shalt.err (!%p1687_p11)
}
  0x55   :  { %79 = dma.hbm_to_vmem [thread:$0]  %s2140_s5, 256, %s74_s28, [#allocation12], %s1747_s13, %s1747_s13, %s1748_s14  }
  0x56   :  { %s1691_s19 = scalar_lea.hbm %s2141_s6, 512 }
  0x57   :  { %p1692_p12 = scmp.ne.s32.totalorder %s2141_s6, %s1691_s19  ;;  %p1695_p13 = scmp.lt.u32.totalorder %s1691_s19, %s2141_s6 }
  0x59   :  { %p1697_p0 = pnand %p1695_p13, %p1692_p12 }
  0x5b   :  { %1700 = shalt.err (!%p1697_p0)
}
  0x5c   :  { %s1701_s24 = scalar_lea.vmem %s1874_s8, 512  ;;  %p1706_p2 = scmp.lt.s32.totalorder %s1874_s8, %s1874_s8 }
  0x5d   :  { %p1702_p1 = scmp.ne.s32.totalorder %s1874_s8, %s1701_s24  ;;  %p1707_p3 = scmp.lt.s32.totalorder %s1701_s24, %s1701_s24 }
  0x5f   :  { %p1708_p4 = por %p1707_p3, %p1706_p2 }
  0x61   :  { %p1709_p5 = pnand %p1708_p4, %p1702_p1 }
  0x63   :  { %1712 = shalt.err (!%p1709_p5)
}
  0x64   :  { %91 = dma.hbm_to_vmem [thread:$0]  %s2141_s6, 512, %s1874_s8, [#allocation15], %s1747_s13, %s1747_s13, %s1748_s14  }
  0x65   :  { %1735 = dma.done.wait [#allocation6], 512  }
  0x66   :  { %1736 = vsyncadd [#allocation6], 4294966784 }
  0x67   :  { %1737 = dma.done.wait [#allocation9], 512  }
  0x68   :  { %1738 = vsyncadd [#allocation9], 4294966784 }
  0x69   :  { %1739 = dma.done.wait [#allocation12], 512  }
  0x6a   :  { %1740 = vsyncadd [#allocation12], 4294966784 }
  0x6b   :  { %1741 = dma.done.wait [#allocation15], 512  }
  0x6c   :  { %1742 = vsyncadd [#allocation15], 4294966784  ;;  %v1753_v0 = vmov 0.0|0.0   ;;  %s111_s26 = smul.f32 2.0, %s2135_s0  ;;  %vm1754_vm0 = vmmov 0   ;;  %v1755_v1 = vmov 0.0   ;;  %v319_v35 = vlaneseq }
  0x6d   :  { %1479 = vmatprep.subr.bf16.mxu0 %v1753_v0  ;;  %1385 = vmatprep.mubr.msk.f32.mxu0 %vm1754_vm0, %v1755_v1  ;;  %vm135_vm1 = vcmask 261120   ;;  %v127_v4 = vld [vmem:[#allocation10] sm:$0xff]  ;;  %v128_v5 = vld [vmem:[#allocation10 + $0x8] sm:$0xff]  ;;  %v125_v6 = vld [vmem:[#allocation8] sm:$0xff]  ;;  %v1756_v18 = vmov 1.0   ;;  %v1990_v38 = vstv %s2135_s0  ;;  %vm329_vm3 = vcmask 130048  }
  0x6e   :  { %v1917_v2 = vstv %s111_s26  ;;  %vm1921_vm2 = vmpackc.low %vm135_vm1, %vm135_vm1  ;;  %v1925_v7 = vpack.c.bf16 %v128_v5, %v127_v4  ;;  %v133_v8 = vmul.f32 %v127_v4, %v127_v4  ;;  %v134_v9 = vmul.f32 %v128_v5, %v128_v5  ;;  %v126_v11 = vld [vmem:[#allocation8 + $0x8] sm:$0xff]  ;;  %v131_v19 = vld [vmem:[#allocation13] sm:$0xff]  ;;  %s1759_s0 = smov [#allocation16]  }
  0x6f   :  { %v228_v10 = vmul.f32 %v1917_v2, %v125_v6  ;;  %v217_v12 = vmul.f32 %v125_v6, %v125_v6  ;;  %v218_v13 = vmul.f32 %v126_v11, %v126_v11  ;;  %v229_v17 = vmul.f32 %v1917_v2, %v126_v11  ;;  %v132_v20 = vld [vmem:[#allocation13 + $0x8] sm:$0xff]  ;;  %v1953_v22 = vld [vmem:[#allocation5] sm:$0xff]  ;;  %v1955_v23 = vld [vmem:[#allocation5 + $0x8] sm:$0xff]  ;;  %s1279_s14 = sshll.u32 %s1759_s0, 4  ;;  %s1280_s14 = int_to_ptr.vmem [resolvable:$true] %s1279_s14 }
  0x70   :  { %1485 = vmatprep.subr.msk.bf16.mxu1 %vm1921_vm2, %v1925_v7  ;;  %v1480_v14 = vpack.c.bf16 %v134_v9, %v133_v8  ;;  %v1946_v21 = vpack.c.bf16 %v132_v20, %v131_v19  ;;  %v1957_v24 = vld [vmem:[#allocation5 + $0x10] sm:$0xff]  ;;  %v1961_v25 = vmul.f32 %v1953_v22, %v1953_v22  ;;  %v1965_v26 = vmul.f32 %v1955_v23, %v1955_v23  ;;  %v1975_v30 = vld [vmem:[#allocation5 + $0x18] sm:$0xff]  ;;  %v129_v61 = vld [vmem:[#allocation11] sm:$0xff]  ;;  %s1713_s28 = scalar_lea.vmem %s1280_s14, 32  ;;  %p1718_p7 = scmp.lt.s32.totalorder %s1280_s14, %s1280_s14 }
  0x71   :  { %1392 = vmatprep.mubr.msk.f32.mxu1 %vm135_vm1, %v228_v10  ;;  %1488 = vmatpush3.bf16.xpose.msk.msra.mxu1 %vm1921_vm2, %v1925_v7  ;;  %v219_v15 = vsel %vm135_vm1, %v217_v12, 0.0  ;;  %v222_v16 = vsel %vm135_vm1, %v218_v13, 0.0  ;;  %v1969_v27 = vmul.f32 %v1957_v24, %v1957_v24  ;;  %v1981_v32 = vmul.f32 %v1975_v30, %v1975_v30  ;;  %v130_v5 = vld [vmem:[#allocation11 + $0x8] sm:$0xff]  ;;  %p1714_p6 = scmp.ne.s32.totalorder %s1280_s14, %s1713_s28  ;;  %p1719_p8 = scmp.lt.s32.totalorder %s1713_s28, %s1713_s28 }
  0x72   :  { %1482 = vmatpush3.bf16.xpose.msk.msra.mxu0 %vm1921_vm2, %v1480_v14  ;;  %220 = vadd.xlane.f32.xlu0 %v219_v15  ;;  %v533_v28 = vsel %vm135_vm1, %v1961_v25, 0.0  ;;  %v536_v31 = vsel %vm135_vm1, %v1965_v26, 0.0  ;;  %v1985_v37 = vshrl.u32 %v319_v35, 7  ;;  %v549_v55 = vmul.f32 %v1953_v22, %v1917_v2 }
  0x73   :  { %1493 = vmatprep.subr.bf16.mxu1 %v1753_v0  ;;  %1490 = vmatprep.subr.bf16.mxu0 %v1946_v21  ;;  %v539_v29 = vsel %vm135_vm1, %v1969_v27, 0.0  ;;  %v542_v33 = vsel %vm135_vm1, %v1981_v32, 0.0  ;;  %v550_v57 = vmul.f32 %v1955_v23, %v1917_v2  ;;  %v551_v58 = vmul.f32 %v1957_v24, %v1917_v2  ;;  %p1720_p9 = por %p1719_p8, %p1718_p7 }
  0x74   :  { %534 = vadd.xlane.f32.xlu1 %v533_v28  ;;  %v321_v42 = vsub.s32 0, %v1985_v37  ;;  %v552_v59 = vmul.f32 %v1975_v30, %v1917_v2  ;;  %v1757_v60 = vmov 1.0|1.0   ;;  %v1513_v10 = vpack.c.bf16 %v1955_v23, %v1953_v22 }
  0x75   :  { %v1519_v11 = vpack.c.bf16 %v1975_v30, %v1957_v24  ;;  %vm118_vm4 = vcmask 1024   ;;  %vm120_vm5 = vcmask 15360   ;;  %vm1123_vm6 = vcmask 31744   ;;  %p1721_p10 = pnand %p1720_p9, %p1714_p6 }
  0x76   :  { %223 = vadd.xlane.f32.xlu0 %v222_v16  ;;  %119 = vst.msk [vmem:[#allocation2] sm:$0x3] %vm118_vm4, %v1755_v1  ;;  %vm1266_vm9 = vcmask 25600  }
  0x77   :  { %122 = vst.msk [vmem:[#allocation3 + $0x8] sm:$0xff] %vm120_vm5, %v1755_v1  ;;  %121 = vst.msk [vmem:[#allocation3] sm:$0xff] %vm120_vm5, %v1755_v1 }
  0x78   :  { %1393 = vmatmul.mubr.msk.f32.vlgmr.msra.gmra.mrb[0].mxu1 %vm135_vm1, %v229_v17  ;;  %537 = vadd.xlane.f32.xlu1 %v536_v31  ;;  %123 = vst.msk [vmem:[#allocation3 + $0x10] sm:$0xff] %vm120_vm5, %v1755_v1  ;;  %124 = vst.msk [vmem:[#allocation3 + $0x18] sm:$0xff] %vm120_vm5, %v1755_v1 }
  0x79   :  { %1386 = vmatmul.mubr.msk.f32.vlgmr.msra.gmra.mrb[0].mxu0 %vm135_vm1, %v1756_v18  ;;  %1406 = vmatprep.mubr.msk.f32.mxu1 %vm1754_vm0, %v1755_v1 }
  0x7a   :  { %1492 = vmatpush3.bf16.msra.mxu0 %v1946_v21  ;;  %540 = vadd.xlane.f32.xlu0 %v539_v29 }
  0x7b   :  { %1497 = vmatprep.subr.msk.bf16.mxu0 %vm1921_vm2, %v1925_v7  ;;  %1494 = vmatpush3.bf16.msra.mxu1 %v1757_v60 }
  0x7c   :  { %543 = vadd.xlane.f32.xlu1 %v542_v33  ;;  %1502 = vmatprep.subr.bf16.mxu1 %v1946_v21 }
  0x80   :  { %791 = vadd.xlane.f32.xlu1 %v533_v28 }
  0x84   :  { %794 = vadd.xlane.f32.xlu1 %v536_v31 }
  0x88   :  { %797 = vadd.xlane.f32.xlu1 %v539_v29 }
  0x8c   :  { %800 = vadd.xlane.f32.xlu1 %v542_v33 }
  0xff   :  { %v221_v34 = vpop.xlane.xlu0 %220 }
 0x100   :  { %v225_v40 = vmul.f32 %v221_v34, %v1990_v38 }
 0x101   :  { %v535_v12 = vpop.xlane.xlu1 %534 }
 0x102   :  { %v545_v14 = vmul.f32 %v535_v12, %v1990_v38 }
 0x103   :  { %v224_v36 = vpop.xlane.xlu0 %223 }
 0x104   :  { %v226_v39 = vmul.f32 %v224_v36, %v1990_v38 }
 0x105   :  { %v538_v13 = vpop.xlane.xlu1 %537 }
 0x106   :  { %v546_v16 = vmul.f32 %v538_v13, %v1990_v38 }
 0x107   :  { %v541_v15 = vpop.xlane.xlu0 %540 }
 0x108   :  { %v547_v20 = vmul.f32 %v541_v15, %v1990_v38 }
 0x109   :  { %v544_v19 = vpop.xlane.xlu1 %543 }
 0x10a   :  { %v548_v23 = vmul.f32 %v544_v19, %v1990_v38 }
 0x14b   :  { %v1394_v41 = vpop.f32.mrb[0].mxu1 }
 0x14c   :  { %v211_v43 = vpop.f32.mrb[0].mxu0  ;;  %v308_v44 = vpop.f32.mrb[1].mxu1  ;;  %v318_v45 = vsub.f32 %v1394_v41, %v226_v39 }
 0x14d   :  { %v216_v46 = vmul.f32 %v1990_v38, %v211_v43  ;;  %v1387_v47 = vpop.f32.mrb[1].mxu0  ;;  %v317_v49 = vsub.f32 %v308_v44, %v225_v40 }
 0x14e   :  { %v2087_v47 = vld [vmem:[#allocation14 + $0x8] sm:$0xff] }
 0x14f   :  { %v1998_v48 = vrot.slane %v216_v46, %v321_v42 }
 0x151   :  { %v324_v50 = vsub.f32 %v318_v45, %v1998_v48  ;;  %v323_v51 = vsub.f32 %v317_v49, %v1998_v48  ;;  %v1506_v45 = vpack.c.bf16 %v1965_v26, %v1961_v25  ;;  %v1758_v25 = vmov 0   ;;  %v2091_v49 = vld [vmem:[#allocation14 + $0x10] sm:$0xff] }
 0x153   :  { %v327_v52 = vmul.f32 1.442695, %v324_v50  ;;  %v325_v53 = vmul.f32 1.442695, %v323_v51  ;;  %v411_v51 = vld [vmem:[#allocation2] sm:$0x3] }
 0x155   :  { %1555 = vpow2.f32 %v327_v52 }
 0x156   :  { %1557 = vpow2.f32 %v325_v53 }
 0x15f   :  { %v1556_v54 = vpop.eup %1555 }
 0x160   :  { %v1558_v56 = vpop.eup %1557 }
 0x161   :  { %1399 = vmatprep.mubr.msk.f32.mxu0 %vm329_vm3, %v1558_v56  ;;  %v667_v56 = vld [vmem:[#allocation3 + $0x8] sm:$0xff] }
 0x162   :  { %1400 = vmatmul.mubr.msk.f32.vlgmr.msra.gmra.mrb[2].mxu0 %vm329_vm3, %v1556_v54 }
 0x163   :  { %1500 = vmatpush3.bf16.xpose.msk.msra.mxu0 %vm1921_vm2, %v1925_v7  ;;  %1413 = vmatprep.mubr.msk.f32.mxu0 %vm135_vm1, %v549_v55 }
 0x164   :  { %1515 = vmatprep.subr.msk.bf16.mxu0 %vm1921_vm2, %v1513_v10 }
 0x16a   :  { %1414 = vmatmul.mubr.msk.f32.vlgmr.msra.gmra.mrb[4].mxu0 %vm135_vm1, %v550_v57 }
 0x16b   :  { %1416 = vmatprep.mubr.msk.f32.mxu0 %vm135_vm1, %v551_v58  ;;  %1518 = vmatpush3.bf16.xpose.msk.msra.mxu0 %vm1921_vm2, %v1513_v10 }
 0x16c   :  { %1521 = vmatprep.subr.msk.bf16.mxu0 %vm1921_vm2, %v1519_v11 }
 0x16e   :  { %1417 = vmatmul.mubr.msk.f32.gmra.mrb[6].mxu0 %vm135_vm1, %v552_v59 }
 0x16f   :  { %1448 = vmatprep.mubr.msk.f32.mxu0 %vm135_vm1, %v549_v55  ;;  %v792_v55 = vpop.xlane.xlu1 %791 }
 0x170   :  { %v802_v13 = vmul.f32 %v792_v55, %v1990_v38 }
 0x173   :  { %1524 = vmatpush3.bf16.xpose.msk.msra.mxu0 %vm1921_vm2, %v1519_v11 }
 0x174   :  { %1533 = vmatprep.subr.bf16.mxu0 %v1753_v0 }
 0x17a   :  { %1449 = vmatmul.mubr.msk.f32.vlgmr.msra.gmra.mrb[8].mxu0 %vm135_vm1, %v550_v57  ;;  %v666_v57 = vld [vmem:[#allocation3] sm:$0xff] }
 0x17b   :  { %1451 = vmatprep.mubr.msk.f32.mxu0 %vm135_vm1, %v551_v58 }
 0x17e   :  { %1452 = vmatmul.mubr.msk.f32.gmra.mrb[10].mxu0 %vm135_vm1, %v552_v59 }
 0x17f   :  { %1476 = vmatprep.mubr.msk.f32.mxu0 %vm1754_vm0, %v1755_v1 }
 0x235   :  { %v1401_v62 = vpop.f32.mrb[2].mxu0 }
 0x236   :  { %v402_v63 = vpop.f32.mrb[3].mxu0  ;;  %v413_v6 = vmul.f32 %v1401_v62, %v130_v5  ;;  %v669_v62 = vld [vmem:[#allocation3 + $0x18] sm:$0xff] }
 0x237   :  { %v412_v4 = vmul.f32 %v402_v63, %v129_v61  ;;  %v795_v63 = vpop.xlane.xlu1 %794 }
 0x238   :  { %v803_v12 = vmul.f32 %v795_v63, %v1990_v38 }
 0x239   :  { %414 = vxpose.xlu0.b32.start [1/2] (short) (narrow) %v412_v4, 8 }
 0x23d   :  { %v1415_v7 = vpop.f32.mrb[4].mxu0  ;;  %415 = vxpose.xlu0.b32.end [2/2] (short) (narrow) %v413_v6, 8 }
 0x23e   :  { %v631_v2 = vpop.f32.mrb[5].mxu0  ;;  %v651_v22 = vsub.f32 %v1415_v7, %v546_v16 }
 0x23f   :  { %v650_v17 = vsub.f32 %v631_v2, %v545_v14 }
 0x240   :  { %v655_v29 = vsub.f32 %v651_v22, %v1998_v48 }
 0x241   :  { %v1418_v8 = vpop.f32.mrb[6].mxu0  ;;  %v654_v24 = vsub.f32 %v650_v17, %v1998_v48 }
 0x242   :  { %v641_v9 = vpop.f32.mrb[7].mxu0  ;;  %v653_v30 = vsub.f32 %v1418_v8, %v548_v23  ;;  %v660_v34 = vmul.f32 1.442695, %v655_v29  ;;  %v798_v8 = vpop.xlane.xlu1 %797 }
 0x243   :  { %v652_v28 = vsub.f32 %v641_v9, %v547_v20  ;;  %v658_v31 = vmul.f32 1.442695, %v654_v24  ;;  %v804_v14 = vmul.f32 %v798_v8, %v1990_v38 }
 0x244   :  { %v657_v35 = vsub.f32 %v653_v30, %v1998_v48 }
 0x245   :  { %v656_v33 = vsub.f32 %v652_v28, %v1998_v48  ;;  %1559 = vpow2.f32 %v658_v31 }
 0x246   :  { %1561 = vpow2.f32 %v660_v34  ;;  %v664_v39 = vmul.f32 1.442695, %v657_v35  ;;  %v801_v11 = vpop.xlane.xlu1 %800 }
 0x247   :  { %v662_v36 = vmul.f32 1.442695, %v656_v33  ;;  %v805_v15 = vmul.f32 %v801_v11, %v1990_v38 }
 0x249   :  { %1563 = vpow2.f32 %v662_v36 }
 0x24a   :  { %1565 = vpow2.f32 %v664_v39 }
 0x24d   :  { %v2077_v3 = vpop.f32.mrb[8].mxu0 }
 0x24e   :  { %v2079_v26 = vpop.f32.mrb[9].mxu0  ;;  %v1003_v19 = vsub.f32 %v2077_v3, %v803_v12 }
 0x24f   :  { %v1560_v41 = vpop.eup %1559  ;;  %v1002_v22 = vsub.f32 %v2079_v26, %v802_v13 }
 0x250   :  { %v1562_v43 = vpop.eup %1561 }
 0x253   :  { %v1564_v44 = vpop.eup %1563 }
 0x254   :  { %v1566_v46 = vpop.eup %1565 }
 0x266   :  { %1554 = vset.pattern.permute.xlu0 %v1758_v25 }
 0x2b9   :  { %v430_v40 = vpop.trf.xlu0 }
 0x2ba   :  { %1407 = vmatmul.mubr.msk.f32.vlgmr.msra.gmra.mrb[2].mxu1 %vm329_vm3, %v430_v40 }
 0x2bb   :  { %1504 = vmatpush3.bf16.msra.mxu1 %v1946_v21  ;;  %1423 = vmatprep.mubr.msk.f32.mxu1 %vm329_vm3, %v1560_v41  ;;  %v1510_v21 = vpack.c.bf16 %v1981_v32, %v1969_v27  ;;  %v2085_v32 = vld [vmem:[#allocation14] sm:$0xff] }
 0x2bc   :  { %1505 = vmatprep.subr.bf16.mxu1 %v1753_v0  ;;  %v1525_v48 = vpack.c.bf16 %v2087_v47, %v2085_v32 }
 0x2be   :  { %1424 = vmatmul.mubr.msk.f32.vlgmr.msra.gmra.mrb[4].mxu1 %vm329_vm3, %v1562_v43  ;;  %1535 = vmatpush3.bf16.msra.mxu0 %v1525_v48 }
 0x2bf   :  { %1426 = vmatprep.mubr.msk.f32.mxu1 %vm329_vm3, %v1564_v44  ;;  %1536 = vmatprep.subr.bf16.mxu0 %v1753_v0 }
 0x2c2   :  { %1427 = vmatmul.mubr.msk.f32.gmra.mrb[6].mxu1 %vm329_vm3, %v1566_v46 }
 0x2c3   :  { %1437 = vmatprep.mubr.msk.f32.mxu1 %vm1754_vm0, %v1755_v1  ;;  %v2093_v1 = vld [vmem:[#allocation14 + $0x18] sm:$0xff] }
 0x2c4   :  { %1508 = vmatpush3.bf16.xpose.msk.msra.mxu1 %vm1921_vm2, %v1506_v45  ;;  %v1529_v50 = vpack.c.bf16 %v2093_v1, %v2091_v49 }
 0x2c5   :  { %1509 = vmatprep.subr.bf16.mxu1 %v1753_v0  ;;  %v668_v0 = vld [vmem:[#allocation3 + $0x10] sm:$0xff] }
 0x2c6   :  { %1538 = vmatpush3.bf16.msra.mxu0 %v1529_v50 }
 0x2cc   :  { %1512 = vmatpush3.bf16.xpose.msk.msra.mxu1 %vm1921_vm2, %v1510_v21 }
 0x2cd   :  { %1526 = vmatprep.subr.bf16.mxu1 %v1525_v48 }
 0x2d3   :  { %1438 = vmatmul.mubr.msk.f32.vlgmr.msra.gmra.mrb[8].mxu1 %vm135_vm1, %v1756_v18  ;;  %v2081_v18 = vpop.f32.mrb[10].mxu0 }
 0x2d4   :  { %v2083_v27 = vpop.f32.mrb[11].mxu0  ;;  %1528 = vmatpush3.bf16.msra.mxu1 %v1525_v48  ;;  %v1005_v23 = vsub.f32 %v2081_v18, %v805_v15 }
 0x2d5   :  { %1530 = vmatprep.subr.bf16.mxu1 %v1529_v50  ;;  %v1004_v24 = vsub.f32 %v2083_v27, %v804_v14 }
 0x2d8   :  { %1532 = vmatpush3.bf16.msra.mxu1 %v1529_v50 }
 0x38d   :  { %v515_v52 = vpop.f32.mrb[2].mxu1 }
 0x38e   :  { %v519_v53 = vadd.f32 %v515_v52, %v411_v51  ;;  %v1408_v54 = vpop.f32.mrb[3].mxu1 }
 0x390   :  { %521 = vst.msk [vmem:[#allocation2] sm:$0x3] %vm118_vm4, %v519_v53 }
 0x391   :  { %v1425_v58 = vpop.f32.mrb[4].mxu1 }
 0x392   :  { %v768_v59 = vadd.f32 %v1425_v58, %v667_v56  ;;  %v748_v60 = vpop.f32.mrb[5].mxu1 }
 0x393   :  { %v767_v61 = vadd.f32 %v748_v60, %v666_v57 }
 0x394   :  { %773 = vst.msk [vmem:[#allocation3 + $0x8] sm:$0xff] %vm120_vm5, %v768_v59 }
 0x395   :  { %772 = vst.msk [vmem:[#allocation3] sm:$0xff] %vm120_vm5, %v767_v61  ;;  %v1428_v4 = vpop.f32.mrb[6].mxu1 }
 0x396   :  { %v770_v5 = vadd.f32 %v1428_v4, %v669_v62  ;;  %v758_v6 = vpop.f32.mrb[7].mxu1 }
 0x397   :  { %v769_v7 = vadd.f32 %v758_v6, %v668_v0  ;;  %v1246_v2 = vld [vmem:[#allocation2] sm:$0x3] }
 0x398   :  { %775 = vst.msk [vmem:[#allocation3 + $0x18] sm:$0xff] %vm120_vm5, %v770_v5  ;;  %1249 = vperm.xlu0 %1554, %v1246_v2  }
 0x399   :  { %774 = vst.msk [vmem:[#allocation3 + $0x10] sm:$0xff] %vm120_vm5, %v769_v7 }
 0x39b   :  { %v1138_v10 = vld [vmem:[#allocation3 + $0x8] sm:$0xff] }
 0x39c   :  { %v1137_v9 = vld [vmem:[#allocation3] sm:$0xff] }
 0x39d   :  { %1141 = vxpose.xlu1.b32.start [1/4] (short) (narrow) %v1137_v9, 8 }
 0x39f   :  { %v1140_v29 = vld [vmem:[#allocation3 + $0x18] sm:$0xff] }
 0x3a0   :  { %v1139_v16 = vld [vmem:[#allocation3 + $0x10] sm:$0xff] }
 0x3a1   :  { %1142 = vxpose.xlu1.b32.cont [2/4] (short) (narrow) %v1138_v10, 8 }
 0x3a5   :  { %1143 = vxpose.xlu1.b32.cont [3/4] (short) (narrow) %v1139_v16, 8 }
 0x3a6   :  { %v884_v17 = vpop.f32.mrb[8].mxu1 }
 0x3a7   :  { %v888_v20 = vmul.f32 %v884_v17, %v1990_v38  ;;  %v1439_v28 = vpop.f32.mrb[9].mxu1 }
 0x3a9   :  { %v1009_v30 = vrot.slane %v888_v20, %v321_v42  ;;  %1144 = vxpose.xlu1.b32.end [4/4] (short) (narrow) %v1140_v29, 8 }
 0x3ab   :  { %v1011_v31 = vsub.f32 %v1003_v19, %v1009_v30  ;;  %v1010_v33 = vsub.f32 %v1002_v22, %v1009_v30  ;;  %v1013_v34 = vsub.f32 %v1005_v23, %v1009_v30  ;;  %v1012_v35 = vsub.f32 %v1004_v24, %v1009_v30 }
 0x3ad   :  { %v1016_v36 = vmul.f32 1.442695, %v1011_v31  ;;  %v1014_v39 = vmul.f32 1.442695, %v1010_v33  ;;  %v1018_v40 = vmul.f32 1.442695, %v1012_v35 }
 0x3ae   :  { %v1020_v38 = vmul.f32 1.442695, %v1013_v34 }
 0x3af   :  { %1567 = vpow2.f32 %v1016_v36 }
 0x3b0   :  { %1569 = vpow2.f32 %v1014_v39 }
 0x3b1   :  { %1571 = vpow2.f32 %v1018_v40 }
 0x3b2   :  { %1573 = vpow2.f32 %v1020_v38 }
 0x3b9   :  { %v1568_v41 = vpop.eup %1567 }
 0x3ba   :  { %v1570_v43 = vpop.eup %1569 }
 0x3bb   :  { %1462 = vmatprep.mubr.msk.f32.mxu1 %vm135_vm1, %v1570_v43  ;;  %v1572_v44 = vpop.eup %1571 }
 0x3bc   :  { %1463 = vmatmul.mubr.msk.f32.vlgmr.msra.gmra.mrb[10].mxu1 %vm135_vm1, %v1568_v41  ;;  %v1574_v37 = vpop.eup %1573 }
 0x3bd   :  { %1465 = vmatprep.mubr.msk.f32.mxu1 %vm135_vm1, %v1572_v44 }
 0x3c0   :  { %1466 = vmatmul.mubr.msk.f32.gmra.mrb[12].mxu1 %vm135_vm1, %v1574_v37 }
 0x41d   :  { %v1157_v42 = vpop.trf.xlu1 }
 0x41e   :  { %1477 = vmatmul.mubr.msk.f32.vlgmr.msra.gmra.mrb[12].mxu0 %vm135_vm1, %v1157_v42 }
 0x48f   :  { %v1464_v45 = vpop.f32.mrb[10].mxu1 }
 0x490   :  { %v1120_v46 = vmul.f32 %v1464_v45, %v2087_v47  ;;  %v1100_v21 = vpop.f32.mrb[11].mxu1 }
 0x491   :  { %v1119_v25 = vmul.f32 %v1100_v21, %v2085_v32  ;;  %v1250_v32 = vpop.permute.xlu0 %1249 }
 0x492   :  { %v1125_v3 = vsel %vm1123_vm6, %v1120_v46, 0.0 }
 0x493   :  { %v1124_v26 = vsel %vm1123_vm6, %v1119_v25, 0.0  ;;  %v1467_v18 = vpop.f32.mrb[12].mxu1 }
 0x494   :  { %v1126_v27 = vadd.f32 %v1125_v3, %v1124_v26  ;;  %v1122_v48 = vmul.f32 %v1467_v18, %v2093_v1  ;;  %v1110_v50 = vpop.f32.mrb[13].mxu1 }
 0x495   :  { %v1121_v51 = vmul.f32 %v1110_v50, %v2091_v49 }
 0x496   :  { %v1129_v52 = vsel %vm1123_vm6, %v1122_v48, 0.0 }
 0x497   :  { %v1127_v53 = vsel %vm1123_vm6, %v1121_v51, 0.0 }
 0x498   :  { %v1128_v54 = vadd.f32 %v1127_v53, %v1126_v27 }
 0x49a   :  { %v1130_v55 = vadd.f32 %v1129_v52, %v1128_v54 }
 0x49c   :  { %v1131_v56 = vrot.slane %v1130_v55, 4 }
 0x49e   :  { %v1132_v57 = vadd.f32 %v1131_v56, %v1130_v55 }
 0x4a0   :  { %v1133_v58 = vrot.slane %v1132_v57, 2 }
 0x4a2   :  { %v1134_v47 = vadd.f32 %v1133_v58, %v1132_v57 }
 0x4a4   :  { %v1135_v59 = vrot.slane %v1134_v47, 1 }
 0x4a6   :  { %v1136_v60 = vadd.f32 %v1135_v59, %v1134_v47 }
 0x4a8   :  { %v1252_v62 = vadd.f32 %v1250_v32, %v1136_v60 }
 0x4f1   :  { %v1242_v61 = vpop.f32.mrb[12].mxu0 }
 0x4f2   :  { %v1253_v0 = vmul.f32 2.0, %v1242_v61  ;;  %v1478_v63 = vpop.f32.mrb[13].mxu0 }
 0x4f4   :  { %v1254_v4 = vsub.f32 %v1252_v62, %v1253_v0 }
 0x4f6   :  { %v1255_v1 = vmax.f32 %v1254_v4, 0.0 }
 0x4f8   :  { %1575 = vrsqrt.f32 %v1255_v1  ;;  %vm1258_vm7 = vcmp.eq.f32.partialorder %v1255_v1, inf  ;;  %v1261_v6 = vand.u32 2147483648, %v1255_v1  ;;  %vm1260_vm8 = vcmp.eq.f32.partialorder %v1255_v1, 0.0 }
 0x502   :  { %v1576_v5 = vpop.eup %1575 }
 0x503   :  { %v1257_v49 = vmul.f32 %v1576_v5, %v1255_v1 }
 0x505   :  { %v1259_v7 = vsel %vm1258_vm7, %v1255_v1, %v1257_v49 }
 0x506   :  { %v1262_v2 = vsel %vm1260_vm8, %v1261_v6, %v1259_v7 }
 0x507   :  { %v1263_v8 = vsub.f32 0.0, %v1262_v2 }
 0x509   :  { %v1264_v9 = vmul.f32 1.442695, %v1263_v8 }
 0x50b   :  { %1577 = vpow2.f32 %v1264_v9 }
 0x515   :  { %v1578_v10 = vpop.eup %1577 }
 0x516   :  { %v1267_v11 = vsel %vm1266_vm9, %v1578_v10, 0.0 }
 0x517   :  { %1268 = vadd.xlane.f32.xlu1 %v1267_v11 }
 0x5a4   :  { %v1269_v12 = vpop.xlane.xlu1 %1268 }
 0x5a5   :  { %1579 = vrcp.f32 %v1269_v12 }
 0x5af   :  { %v1580_v13 = vpop.eup %1579 }
 0x5b0   :  { %v1271_v14 = vmul.f32 %v1580_v13, %v1578_v10 }
 0x5b2   :  { %1272 = vst.msk [vmem:[#allocation16] sm:$0x3] %vm1266_vm9, %v1271_v14 }
 0x5b3   :  { %1724 = shalt.err (!%p1721_p10)
}
 0x5b4   :  { %s1725_s9 = scalar_lea.hbm %s2142_s7, 32 }
 0x5b5   :  { %p1726_p11 = scmp.ne.s32.totalorder %s2142_s7, %s1725_s9  ;;  %p1729_p12 = scmp.lt.u32.totalorder %s1725_s9, %s2142_s7 }
 0x5b7   :  { %p1731_p13 = pnand %p1729_p12, %p1726_p11 }
 0x5b9   :  { %1734 = shalt.err (!%p1731_p13)
}
 0x5ba   :  { %1282 = dma.vmem_to_hbm [thread:$0]  %s1280_s14, 32, %s2142_s7, [#allocation7]  }
 0x5bb   :  { %1743 = dma.done.wait [#allocation7], 32  }
 0x5bc   :  { %1744 = vsyncadd [#allocation7], 4294967264 }
 0x5bd   :  { %1286 = vsyncpa [#allocation6], 1 }
 0x5be   :  { %1287 = vsyncpa [#allocation9], 1 }
 0x5bf   :  { %1288 = vsyncpa [#allocation12], 1 }
 0x5c0   :  { %1289 = vsyncpa [#allocation15], 1 }
 0x5c1   :  { %1290 = vsyncpa [#allocation7], 1 }

</bundles_post_ra>
